<compile_context>
chip_gen: v7x
topology: tpu7x:2x2x1
jax: 0.10.0
libtpu: 0.0.40
codegen_flags: <defaults>
</compile_context>

<pallas_src>
import math
import functools

import jax
import jax.numpy as jnp
from jax.experimental import pallas as pl
from jax.experimental.pallas import tpu as pltpu


_SQRT_2_OVER_PI = math.sqrt(2.0 / math.pi)


def _gelu_tanh(x):
    # GELU with tanh approximation (matches torch.nn.GELU(approximate='tanh')).
    return 0.5 * x * (1.0 + jnp.tanh(_SQRT_2_OVER_PI * (x + 0.044715 * x * x * x)))


def _round_up(n, m):
    return ((n + m - 1) // m) * m


# ----------------------------- kernels -------------------------------------


def mlp_kernel_resident(x_ref, w1_ref, b1_ref, w2_ref, b2_ref, o_ref):
    """Whole W1/W2 resident in VMEM; grid = (token tiles,)."""
    x = x_ref[...]
    if x.dtype != w1_ref.dtype:
        x = x.astype(w1_ref.dtype)
    h = jnp.dot(x, w1_ref[...], preferred_element_type=jnp.float32)
    h = _gelu_tanh(h + b1_ref[...])
    out = jnp.dot(h.astype(w2_ref.dtype), w2_ref[...],
                  preferred_element_type=jnp.float32) + b2_ref[...]
    o_ref[...] = out.astype(o_ref.dtype)


def mlp_kernel_chunked(x_ref, w1_ref, b1_ref, w2_ref, b2_ref, o_ref, acc_ref):
    """Hidden dimension tiled; grid = (token tiles, hidden chunks)."""
    k = pl.program_id(1)
    x = x_ref[...]
    if x.dtype != w1_ref.dtype:
        x = x.astype(w1_ref.dtype)
    h = jnp.dot(x, w1_ref[...], preferred_element_type=jnp.float32)
    h = _gelu_tanh(h + b1_ref[...])
    contrib = jnp.dot(h.astype(w2_ref.dtype), w2_ref[...],
                      preferred_element_type=jnp.float32)

    @pl.when(k == 0)
    def _():
        # Initialize accumulator with first chunk + output bias: saves a full
        # (tm, C) fp32 zero-fill and the epilogue bias add.
        acc_ref[...] = contrib + b2_ref[...]

    @pl.when(k > 0)
    def _():
        acc_ref[...] += contrib

    @pl.when(k == pl.num_programs(1) - 1)
    def _():
        o_ref[...] = acc_ref[...].astype(o_ref.dtype)


# ------------------------- parameter preparation ---------------------------


def prepare_mlp_params(w_fc, b_fc, w_proj, b_proj, param_dtype=jnp.bfloat16):
    """One-time conversion from PyTorch nn.Linear layout to kernel layout.

    w_fc: (4C, C), w_proj: (C, 4C)  ->  w1: (C, 4C), w2: (4C, C).
    Weights are cast to `param_dtype` (bf16 default: halves HBM traffic and
    doubles MXU throughput); biases stay fp32.  Do this once at parameter-load
    time, not on the per-call hot path.
    """
    H = w_fc.shape[0]
    C = w_proj.shape[0]
    w1 = jnp.asarray(w_fc).T.astype(param_dtype)          # (C, H)
    w2 = jnp.asarray(w_proj).T.astype(param_dtype)         # (H, C)
    b1 = jnp.asarray(b_fc, dtype=jnp.float32).reshape(1, H)
    b2 = jnp.asarray(b_proj, dtype=jnp.float32).reshape(1, C)
    return w1, b1, w2, b2


# ----------------------------- tile planning -------------------------------


def _vmem_budget_bytes():
    """Generation-aware VMEM budget (leave headroom below physical capacity)."""
    try:
        kind = jax.devices()[0].device_kind.lower()
    except Exception:
        kind = ""
    if "v5" in kind or "v6" in kind:
        return 100 * 1024 * 1024        # 128 MiB physical on v5e/v6e
    # v7x has 64 MiB per TensorCore; unknown devices treated conservatively.
    return 48 * 1024 * 1024


def _largest_hidden_chunk(H, th_max):
    """Largest divisor of H that is a multiple of 128 and <= th_max (else H)."""
    best = None
    d = 128
    limit = min(H, th_max)
    while d <= limit:
        if H % d == 0:
            best = d
        d += 128
    return best if best is not None else H


def _resident_fits(tm, C, H, x_bytes, w_bytes, out_bytes, budget):
    wbytes = 2 * 2 * C * H * w_bytes               # double-buffered W1 + W2
    io = 2 * tm * C * (x_bytes + out_bytes)        # double-buffered x / out tiles
    hid = tm * H * (4 + w_bytes)                   # fp32 hidden + low-prec copy
    misc = 4 * (H + C) * 4
    return wbytes + io + hid + misc <= budget


def _chunked_fits(tm, th, C, H, x_bytes, w_bytes, out_bytes, budget):
    wbytes = 2 * 2 * C * th * w_bytes
    io = 2 * tm * C * (x_bytes + out_bytes)
    acc = tm * C * 4
    hid = tm * th * (4 + w_bytes)
    misc = 4 * (th + C) * 4
    return wbytes + io + acc + hid + misc <= budget


# ------------------------------- forward -----------------------------------


@functools.partial(jax.jit, static_argnames=("tm", "th", "interpret"))
def mlp_forward(x, w1, b1, w2, b2, *, tm=None, th=None, interpret=False):
    """x: (..., C); w1: (C, H); b1: (1, H) fp32; w2: (H, C); b2: (1, C) fp32."""
    *lead, C = x.shape
    H = w1.shape[1]
    M = 1
    for d in lead:
        M *= d

    x2d = x.reshape(M, C)

    x_bytes = x2d.dtype.itemsize
    w_bytes = w1.dtype.itemsize
    out_bytes = x2d.dtype.itemsize
    budget = _vmem_budget_bytes()

    # ---- token tile (no padding: ragged last tile handled by Pallas) ----
    tm_eff = 1024 if tm is None else max(8, _round_up(tm, 8))
    if M <= tm_eff:
        tm_eff = M          # block == full dim is always a legal block shape

    # ---- plan: weights-resident vs hidden-chunked ----
    use_resident = False
    if th is None or th >= H:
        for tm_try in (tm_eff, 512, 256, 128):
            tm_try = min(tm_try, tm_eff)
            if _resident_fits(tm_try, C, H, x_bytes, w_bytes, out_bytes, budget):
                use_resident = True
                tm_eff = tm_try
                break

    if use_resident:
        grid = (pl.cdiv(M, tm_eff),)
        out2d = pl.pallas_call(
            mlp_kernel_resident,
            out_shape=jax.ShapeDtypeStruct((M, C), x.dtype),
            grid_spec=pltpu.PrefetchScalarGridSpec(
                num_scalar_prefetch=0,
                grid=grid,
                in_specs=[
                    pl.BlockSpec((tm_eff, C), lambda i: (i, 0)),  # x token tile
                    pl.BlockSpec((C, H), lambda i: (0, 0)),       # W1 resident
                    pl.BlockSpec((1, H), lambda i: (0, 0)),       # b1
                    pl.BlockSpec((H, C), lambda i: (0, 0)),       # W2 resident
                    pl.BlockSpec((1, C), lambda i: (0, 0)),       # b2
                ],
                out_specs=pl.BlockSpec((tm_eff, C), lambda i: (i, 0)),
            ),
            compiler_params=pltpu.CompilerParams(
                dimension_semantics=("parallel",),
                vmem_limit_bytes=budget,
            ),
            interpret=interpret,
        )(x2d, w1, b1, w2, b2)
    else:
        th_eff = _largest_hidden_chunk(H, 512 if th is None else max(th, 128))
        while tm_eff > 128 and not _chunked_fits(
                tm_eff, th_eff, C, H, x_bytes, w_bytes, out_bytes, budget):
            tm_eff = max(128, tm_eff // 2)
        grid = (pl.cdiv(M, tm_eff), H // th_eff)
        out2d = pl.pallas_call(
            mlp_kernel_chunked,
            out_shape=jax.ShapeDtypeStruct((M, C), x.dtype),
            grid_spec=pltpu.PrefetchScalarGridSpec(
                num_scalar_prefetch=0,
                grid=grid,
                in_specs=[
                    pl.BlockSpec((tm_eff, C), lambda i, k: (i, 0)),   # x tile
                    pl.BlockSpec((C, th_eff), lambda i, k: (0, k)),   # W1 chunk
                    pl.BlockSpec((1, th_eff), lambda i, k: (0, k)),   # b1 chunk
                    pl.BlockSpec((th_eff, C), lambda i, k: (k, 0)),   # W2 chunk
                    pl.BlockSpec((1, C), lambda i, k: (0, 0)),        # b2
                ],
                out_specs=pl.BlockSpec((tm_eff, C), lambda i, k: (i, 0)),
                scratch_shapes=[pltpu.VMEM((tm_eff, C), jnp.float32)],
            ),
            compiler_params=pltpu.CompilerParams(
                dimension_semantics=("parallel", "arbitrary"),
                vmem_limit_bytes=budget,
            ),
            interpret=interpret,
        )(x2d, w1, b1, w2, b2)

    return out2d.reshape(*lead, C)


# ------------------------------- reference ---------------------------------


def mlp_reference(x, w_fc, b_fc, w_proj, b_proj):
    h = _gelu_tanh(jnp.einsum("...c,hc->...h", x, w_fc) + b_fc)
    return jnp.einsum("...h,ch->...c", h, w_proj) + b_proj


if __name__ == "__main__":
    key = jax.random.PRNGKey(0)

    # --- Test 1: fp32 params, weights-resident path (small GPT-like config) ---
    B, T, C = 2, 8, 32
    H = 4 * C
    kx, k1, k2, k3, k4, key = jax.random.split(key, 6)
    x = jax.random.normal(kx, (B, T, C), dtype=jnp.float32)
    # Params in PyTorch nn.Linear layout (weight is (out_features, in_features)).
    w_fc = jax.random.normal(k1, (H, C), dtype=jnp.float32) * 0.02
    b_fc = jax.random.normal(k2, (H,), dtype=jnp.float32) * 0.02
    w_proj = jax.random.normal(k3, (C, H), dtype=jnp.float32) * 0.02
    b_proj = jax.random.normal(k4, (C,), dtype=jnp.float32) * 0.02

    w1, b1, w2, b2 = prepare_mlp_params(w_fc, b_fc, w_proj, b_proj,
                                        param_dtype=jnp.float32)
    out = jax.block_until_ready(mlp_forward(x, w1, b1, w2, b2))
    ref = mlp_reference(x, w_fc, b_fc, w_proj, b_proj)
    assert out.shape == (B, T, C)
    assert jnp.allclose(out, ref, atol=1e-3, rtol=1e-3), "fp32 resident mismatch"

    # --- Test 2: bf16 params, chunked (hidden-dim tiled) path ---
    B2, T2, C2 = 2, 8, 64
    H2 = 4 * C2
    kx, k1, k2, k3, k4, key = jax.random.split(key, 6)
    x2 = jax.random.normal(kx, (B2, T2, C2), dtype=jnp.float32)
    w_fc2 = jax.random.normal(k1, (H2, C2), dtype=jnp.float32) * 0.02
    b_fc2 = jax.random.normal(k2, (H2,), dtype=jnp.float32) * 0.02
    w_proj2 = jax.random.normal(k3, (C2, H2), dtype=jnp.float32) * 0.02
    b_proj2 = jax.random.normal(k4, (C2,), dtype=jnp.float32) * 0.02

    w1b, b1b, w2b, b2b = prepare_mlp_params(w_fc2, b_fc2, w_proj2, b_proj2,
                                            param_dtype=jnp.bfloat16)
    out2 = jax.block_until_ready(mlp_forward(x2, w1b, b1b, w2b, b2b, th=128))
    # Reference uses the same bf16-rounded operands (so we test the kernel,
    # not the quantization), with fp32 math.
    ref2 = mlp_reference(
        x2.astype(jnp.bfloat16).astype(jnp.float32),
        w_fc2.astype(jnp.bfloat16).astype(jnp.float32), b_fc2,
        w_proj2.astype(jnp.bfloat16).astype(jnp.float32), b_proj2)
    assert out2.shape == (B2, T2, C2)
    assert jnp.allclose(out2, ref2, atol=2e-2, rtol=2e-2), "bf16 chunked mismatch"

    # --- Test 3: ragged token count (M not a multiple of the token tile) ---
    x3 = x[:, :7, :]                       # (2, 7, 32) -> M = 14
    out3 = jax.block_until_ready(mlp_forward(x3, w1, b1, w2, b2, tm=8))
    ref3 = mlp_reference(x3, w_fc, b_fc, w_proj, b_proj)
    assert out3.shape == x3.shape
    assert jnp.allclose(out3, ref3, atol=1e-3, rtol=1e-3), "ragged tile mismatch"

    print("KERNEL_OK")
</pallas_src>

<mosaic_0001>
module attributes {stable_mosaic.version = 11 : i64} {
  func.func @mlp_kernel_resident(%arg0: i32, %arg1: memref<16x32xf32, #tpu.memory_space<vmem>>, %arg2: memref<32x128xf32, #tpu.memory_space<vmem>>, %arg3: memref<1x128xf32, #tpu.memory_space<vmem>>, %arg4: memref<128x32xf32, #tpu.memory_space<vmem>>, %arg5: memref<1x32xf32, #tpu.memory_space<vmem>>, %arg6: memref<16x32xf32, #tpu.memory_space<vmem>>) attributes {dimension_semantics = [#tpu.dimension_semantics<parallel>], iteration_bounds = array<i64: 1>, scalar_prefetch = 0 : i64, scratch_operands = 0 : i64, tpu.core_type = #tpu.core_type<tc>, window_params = [{transform_indices = @transform_0, window_bounds = array<i64: 16, 32>}, {pipeline_mode = #tpu.pipeline_mode<synchronous>, transform_indices = @transform_1, window_bounds = array<i64: 32, 128>}, {pipeline_mode = #tpu.pipeline_mode<synchronous>, transform_indices = @transform_2, window_bounds = array<i64: 1, 128>}, {pipeline_mode = #tpu.pipeline_mode<synchronous>, transform_indices = @transform_3, window_bounds = array<i64: 128, 32>}, {pipeline_mode = #tpu.pipeline_mode<synchronous>, transform_indices = @transform_4, window_bounds = array<i64: 1, 32>}, {transform_indices = @transform_5, window_bounds = array<i64: 16, 32>}]} {
    %c0 = arith.constant 0 : index
    %c0_0 = arith.constant 0 : index
    %0 = vector.load %arg1[%c0, %c0_0] : memref<16x32xf32, #tpu.memory_space<vmem>>, vector<16x32xf32>
    %c0_1 = arith.constant 0 : index
    %c0_2 = arith.constant 0 : index
    %1 = vector.load %arg2[%c0_1, %c0_2] : memref<32x128xf32, #tpu.memory_space<vmem>>, vector<32x128xf32>
    %cst = arith.constant dense<0.000000e+00> : vector<16x128xf32>
    %2 = tpu.matmul %0, %1, %cst {dimension_numbers = #tpu.dot_dimension_numbers<[1], [0], [0], [1], [0, 0, 1, 1], [], []>} : vector<16x32xf32>, vector<32x128xf32>, vector<16x128xf32> -> vector<16x128xf32>
    %c0_3 = arith.constant 0 : index
    %c0_4 = arith.constant 0 : index
    %3 = vector.load %arg3[%c0_3, %c0_4] : memref<1x128xf32, #tpu.memory_space<vmem>>, vector<1x128xf32>
    %4 = vector.broadcast %3 : vector<1x128xf32> to vector<16x128xf32>
    %5 = arith.addf %2, %4 : vector<16x128xf32>
    %cst_5 = arith.constant 5.000000e-01 : f32
    %6 = vector.broadcast %cst_5 : f32 to vector<16x128xf32>
    %7 = arith.mulf %6, %5 : vector<16x128xf32>
    %cst_6 = arith.constant 4.471500e-02 : f32
    %8 = vector.broadcast %cst_6 : f32 to vector<16x128xf32>
    %9 = arith.mulf %8, %5 : vector<16x128xf32>
    %10 = arith.mulf %9, %5 : vector<16x128xf32>
    %11 = arith.mulf %10, %5 : vector<16x128xf32>
    %12 = arith.addf %5, %11 : vector<16x128xf32>
    %cst_7 = arith.constant 0.797884583 : f32
    %13 = vector.broadcast %cst_7 : f32 to vector<16x128xf32>
    %14 = arith.mulf %13, %12 : vector<16x128xf32>
    %15 = math.tanh %14 : vector<16x128xf32>
    %cst_8 = arith.constant 1.000000e+00 : f32
    %16 = vector.broadcast %cst_8 : f32 to vector<16x128xf32>
    %17 = arith.addf %16, %15 : vector<16x128xf32>
    %18 = arith.mulf %7, %17 : vector<16x128xf32>
    %c0_9 = arith.constant 0 : index
    %c0_10 = arith.constant 0 : index
    %19 = vector.load %arg4[%c0_9, %c0_10] : memref<128x32xf32, #tpu.memory_space<vmem>>, vector<128x32xf32>
    %cst_11 = arith.constant dense<0.000000e+00> : vector<16x32xf32>
    %20 = tpu.matmul %18, %19, %cst_11 {dimension_numbers = #tpu.dot_dimension_numbers<[1], [0], [0], [1], [0, 0, 1, 1], [], []>} : vector<16x128xf32>, vector<128x32xf32>, vector<16x32xf32> -> vector<16x32xf32>
    %c0_12 = arith.constant 0 : index
    %c0_13 = arith.constant 0 : index
    %21 = vector.load %arg5[%c0_12, %c0_13] : memref<1x32xf32, #tpu.memory_space<vmem>>, vector<1x32xf32>
    %22 = vector.broadcast %21 : vector<1x32xf32> to vector<16x32xf32>
    %23 = arith.addf %20, %22 : vector<16x32xf32>
    %c0_14 = arith.constant 0 : index
    %c0_15 = arith.constant 0 : index
    %24 = vector.load %arg6[%c0_14, %c0_15] : memref<16x32xf32, #tpu.memory_space<vmem>>, vector<16x32xf32>
    tpu.vector_store %arg6[%c0_14, %c0_15], %23 {strides = array<i32>} : memref<16x32xf32, #tpu.memory_space<vmem>>, vector<16x32xf32>,
    return
  }
  func.func @transform_0(%arg0: i32) -> (i32, i32) {
    %c0_i32 = arith.constant 0 : i32
    %c0_i32_0 = arith.constant 0 : i32
    return %arg0, %c0_i32 : i32, i32
  }
  func.func @transform_1(%arg0: i32) -> (i32, i32) {
    %c0_i32 = arith.constant 0 : i32
    %c0_i32_0 = arith.constant 0 : i32
    %c0_i32_1 = arith.constant 0 : i32
    return %c0_i32, %c0_i32_0 : i32, i32
  }
  func.func @transform_2(%arg0: i32) -> (i32, i32) {
    %c0_i32 = arith.constant 0 : i32
    %c0_i32_0 = arith.constant 0 : i32
    %c0_i32_1 = arith.constant 0 : i32
    return %c0_i32, %c0_i32_0 : i32, i32
  }
  func.func @transform_3(%arg0: i32) -> (i32, i32) {
    %c0_i32 = arith.constant 0 : i32
    %c0_i32_0 = arith.constant 0 : i32
    %c0_i32_1 = arith.constant 0 : i32
    return %c0_i32, %c0_i32_0 : i32, i32
  }
  func.func @transform_4(%arg0: i32) -> (i32, i32) {
    %c0_i32 = arith.constant 0 : i32
    %c0_i32_0 = arith.constant 0 : i32
    %c0_i32_1 = arith.constant 0 : i32
    return %c0_i32, %c0_i32_0 : i32, i32
  }
  func.func @transform_5(%arg0: i32) -> (i32, i32) {
    %c0_i32 = arith.constant 0 : i32
    %c0_i32_0 = arith.constant 0 : i32
    return %arg0, %c0_i32 : i32, i32
  }
}

</mosaic_0001>

<bundles_post_ra>
// kernel: mlp_forward.1
= control target key start
LH: loop header
LB: loop body
LE: loop exit
PB: predicated region body
PF: predicated region fallthrough
CT: control target
= control target key end

     0   :  { %vm34_vm0 = vcmask 261120   ;;  %s516_s0 = inlined_call_operand.vmem [shape: f32[16,32], index: 0, kind: input, shape index: {}]   ;;  %s517_s1 = inlined_call_operand.vmem [shape: f32[32,128], index: 1, kind: input, shape index: {}]   ;;  %s518_s2 = inlined_call_operand.vmem [shape: f32[1,128], index: 2, kind: input, shape index: {}]   ;;  %s519_s3 = inlined_call_operand.vmem [shape: f32[128,32], index: 3, kind: input, shape index: {}]   ;;  %s520_s4 = inlined_call_operand.vmem [shape: f32[1,32], index: 4, kind: input, shape index: {}]   ;;  %s521_s5 = inlined_call_operand.hbm [shape: f32[16,32], index: 5, kind: output, shape index: {}]  }
   0x1   :  { %v23_v0 = vld [vmem:[%s517_s1] sm:$0xff]  ;;  %v24_v1 = vld [vmem:[%s517_s1 + $0x8] sm:$0xff]  ;;  %v25_v2 = vld [vmem:[%s517_s1 + $0x10] sm:$0xff] }
   0x2   :  { %v324_v3 = vpack.c.bf16 %v24_v1, %v23_v0  ;;  %v26_v4 = vld [vmem:[%s517_s1 + $0x18] sm:$0xff]  ;;  %v21_v5 = vld [vmem:[%s516_s0] sm:$0xff]  ;;  %v135_v8 = vld [vmem:[%s519_s3 + $0x8] sm:$0xff] }
   0x3   :  { %v328_v6 = vpack.c.bf16 %v26_v4, %v25_v2  ;;  %286 = vmatprep.mubr.msk.f32.mxu0 %vm34_vm0, %v21_v5  ;;  %v134_v7 = vld [vmem:[%s519_s3] sm:$0xff] }
   0x4   :  { %10 = vsyncpa [#allocation3], 0  ;;  %325 = vmatprep.subr.bf16.mxu0 %v324_v3  ;;  %v332_v9 = vpack.c.bf16 %v135_v8, %v134_v7  ;;  %v22_v10 = vld [vmem:[%s516_s0 + $0x8] sm:$0xff]  ;;  %v136_v11 = vld [vmem:[%s519_s3 + $0x10] sm:$0xff]  ;;  %s395_s11 = smov [#allocation2]  }
   0x5   :  { %327 = vmatpush3.bf16.msra.mxu0 %v324_v3  ;;  %v137_v12 = vld [vmem:[%s519_s3 + $0x18] sm:$0xff]  ;;  %v138_v14 = vld [vmem:[%s519_s3 + $0x20] sm:$0xff]  ;;  %v139_v15 = vld [vmem:[%s519_s3 + $0x28] sm:$0xff]  ;;  %s239_s12 = sshll.u32 %s395_s11, 4  ;;  %s240_s12 = int_to_ptr.vmem [resolvable:$true] %s239_s12 }
   0x6   :  { %329 = vmatprep.subr.bf16.mxu0 %v328_v6  ;;  %333 = vmatprep.subr.bf16.mxu1 %v332_v9  ;;  %v336_v13 = vpack.c.bf16 %v137_v12, %v136_v11  ;;  %v340_v16 = vpack.c.bf16 %v139_v15, %v138_v14  ;;  %v140_v17 = vld [vmem:[%s519_s3 + $0x30] sm:$0xff]  ;;  %v141_v18 = vld [vmem:[%s519_s3 + $0x38] sm:$0xff]  ;;  %v142_v19 = vld [vmem:[%s519_s3 + $0x40] sm:$0xff]  ;;  %s371_s13 = scalar_lea.vmem %s240_s12, 256  ;;  %p376_p1 = scmp.lt.s32.totalorder %s240_s12, %s240_s12 }
   0x7   :  { %335 = vmatpush3.bf16.msra.mxu1 %v332_v9  ;;  %v344_v20 = vpack.c.bf16 %v141_v18, %v140_v17  ;;  %v143_v21 = vld [vmem:[%s519_s3 + $0x48] sm:$0xff]  ;;  %v144_v23 = vld [vmem:[%s519_s3 + $0x50] sm:$0xff]  ;;  %v145_v24 = vld [vmem:[%s519_s3 + $0x58] sm:$0xff]  ;;  %p372_p0 = scmp.ne.s32.totalorder %s240_s12, %s371_s13  ;;  %p377_p2 = scmp.lt.s32.totalorder %s371_s13, %s371_s13 }
   0x8   :  { %337 = vmatprep.subr.bf16.mxu1 %v336_v13  ;;  %v348_v22 = vpack.c.bf16 %v143_v21, %v142_v19  ;;  %v352_v25 = vpack.c.bf16 %v145_v24, %v144_v23  ;;  %v146_v26 = vld [vmem:[%s519_s3 + $0x60] sm:$0xff]  ;;  %v147_v27 = vld [vmem:[%s519_s3 + $0x68] sm:$0xff]  ;;  %v148_v29 = vld [vmem:[%s519_s3 + $0x70] sm:$0xff] }
   0x9   :  { %331 = vmatpush3.bf16.msra.mxu0 %v328_v6  ;;  %v356_v28 = vpack.c.bf16 %v147_v27, %v146_v26  ;;  %v149_v30 = vld [vmem:[%s519_s3 + $0x78] sm:$0xff]  ;;  %v250_v32 = vld [vmem:[%s518_s2] ss:$0 sm:$0xff]  ;;  %p378_p3 = por %p377_p2, %p376_p1 }
   0xa   :  { %v360_v31 = vpack.c.bf16 %v149_v30, %v148_v29  ;;  %v253_v55 = vld [vmem:[%s520_s4] ss:$0 sm:$0xff] }
   0xb   :  { %339 = vmatpush3.bf16.msra.mxu1 %v336_v13  ;;  %p379_p4 = pnand %p378_p3, %p372_p0 }
   0xc   :  { %287 = vmatmul.mubr.msk.f32.vlgmr.msra.gmra.mrb[0].mxu0 %vm34_vm0, %v22_v10  ;;  %341 = vmatprep.subr.bf16.mxu1 %v340_v16 }
   0xf   :  { %343 = vmatpush3.bf16.msra.mxu1 %v340_v16 }
  0x10   :  { %345 = vmatprep.subr.bf16.mxu1 %v344_v20 }
  0x13   :  { %347 = vmatpush3.bf16.msra.mxu1 %v344_v20 }
  0x14   :  { %349 = vmatprep.subr.bf16.mxu1 %v348_v22 }
  0x17   :  { %351 = vmatpush3.bf16.msra.mxu1 %v348_v22 }
  0x18   :  { %353 = vmatprep.subr.bf16.mxu1 %v352_v25 }
  0x1b   :  { %355 = vmatpush3.bf16.msra.mxu1 %v352_v25 }
  0x1c   :  { %357 = vmatprep.subr.bf16.mxu1 %v356_v28 }
  0x1f   :  { %359 = vmatpush3.bf16.msra.mxu1 %v356_v28 }
  0x20   :  { %361 = vmatprep.subr.bf16.mxu1 %v360_v31 }
  0x23   :  { %363 = vmatpush3.bf16.msra.mxu1 %v360_v31 }
  0xdf   :  { %v288_v33 = vpop.f32.mrb[0].mxu0 }
  0xe0   :  { %v113_v34 = vadd.f32 %v288_v33, %v250_v32  ;;  %v107_v35 = vpop.f32.mrb[1].mxu0 }
  0xe1   :  { %v108_v36 = vadd.f32 %v250_v32, %v107_v35 }
  0xe2   :  { %v119_v37 = vmul.f32 0.044715, %v113_v34  ;;  %v117_v52 = vmul.f32 0.5, %v113_v34 }
  0xe3   :  { %v118_v38 = vmul.f32 0.044715, %v108_v36  ;;  %v116_v50 = vmul.f32 0.5, %v108_v36 }
  0xe4   :  { %v121_v39 = vmul.f32 %v119_v37, %v113_v34 }
  0xe5   :  { %v120_v40 = vmul.f32 %v118_v38, %v108_v36 }
  0xe6   :  { %v123_v41 = vmul.f32 %v121_v39, %v113_v34 }
  0xe7   :  { %v122_v42 = vmul.f32 %v120_v40, %v108_v36 }
  0xe8   :  { %v125_v43 = vadd.f32 %v123_v41, %v113_v34 }
  0xe9   :  { %v124_v44 = vadd.f32 %v122_v42, %v108_v36 }
  0xea   :  { %v127_v45 = vmul.f32 0.7978846, %v125_v43 }
  0xeb   :  { %v126_v46 = vmul.f32 0.7978846, %v124_v44 }
  0xec   :  { %367 = vtanh.f32 %v127_v45 }
  0xed   :  { %369 = vtanh.f32 %v126_v46 }
  0xf6   :  { %v368_v47 = vpop.eup %367 }
  0xf7   :  { %v370_v48 = vpop.eup %369  ;;  %v131_v49 = vadd.f32 1.0, %v368_v47 }
  0xf8   :  { %v130_v51 = vadd.f32 1.0, %v370_v48 }
  0xf9   :  { %v133_v54 = vmul.f32 %v131_v49, %v117_v52 }
  0xfa   :  { %v132_v53 = vmul.f32 %v130_v51, %v116_v50 }
  0xfc   :  { %321 = vmatprep.mubr.f32.mxu1 %v132_v53 }
  0xfd   :  { %322 = vmatmul.mubr.f32.vlgmr.msra.gmra.mrb[0].mxu1 %v133_v54 }
 0x1d0   :  { %v323_v56 = vpop.f32.mrb[0].mxu1 }
 0x1d1   :  { %v229_v57 = vadd.f32 %v323_v56, %v253_v55  ;;  %v223_v58 = vpop.f32.mrb[1].mxu1 }
 0x1d2   :  { %v224_v59 = vadd.f32 %v253_v55, %v223_v58 }
 0x1d3   :  { %233 = vst.msk [vmem:[#allocation2 + $0x8] sm:$0xff] %vm34_vm0, %v229_v57 }
 0x1d4   :  { %232 = vst.msk [vmem:[#allocation2] sm:$0xff] %vm34_vm0, %v224_v59 }
 0x1d5   :  { %382 = shalt.err (!%p379_p4)
}
 0x1d6   :  { %s383_s15 = scalar_lea.hbm %s521_s5, 256 }
 0x1d7   :  { %p384_p5 = scmp.ne.s32.totalorder %s521_s5, %s383_s15  ;;  %p387_p6 = scmp.lt.u32.totalorder %s383_s15, %s521_s5 }
 0x1d9   :  { %p389_p7 = pnand %p387_p6, %p384_p5 }
 0x1db   :  { %392 = shalt.err (!%p389_p7)
}
 0x1dc   :  { %s396_s19 = smov 128   ;;  %s397_s20 = smov 8  }
 0x1dd   :  { %245 = dma.vmem_to_hbm [thread:$0]  %s240_s12, 256, %s521_s5, [#allocation3], %s396_s19, %s396_s19, %s397_s20  }
 0x1de   :  { %393 = dma.done.wait [#allocation3], 256  }
 0x1df   :  { %394 = vsyncadd [#allocation3], 4294967040 }
 0x1e0   :  { %249 = vsyncpa [#allocation3], 1 }

</bundles_post_ra>
